<compile_context>
chip_gen: v6e
topology: v6e:2x2x1
jax: 0.10.0
libtpu: 0.0.40
codegen_flags: <defaults>
</compile_context>

<pallas_src>
import math

import jax
import jax.numpy as jnp
from jax.experimental import pallas as pl
from jax.experimental.pallas import tpu as pltpu

TB_GRAIN = 16  # bf16 sublane packing (16, 128): batch tiles are multiples of 16


def _round_up(x, m):
    return ((x + m - 1) // m) * m


def xavier_uniform(key, fan_in, fan_out, dtype=jnp.float32):
    """Matches torch.nn.init.xavier_uniform_ (gain=1)."""
    limit = math.sqrt(6.0 / (fan_in + fan_out))
    return jax.random.uniform(
        key, (fan_in, fan_out), dtype=dtype, minval=-limit, maxval=limit
    )


def init_actor_params(key, state_dim, action_dim, hidden_dims):
    """Deterministic parameter init: xavier-uniform weights, zero biases."""
    dims = [state_dim] + list(hidden_dims) + [action_dim]
    params = []
    for i in range(len(dims) - 1):
        key, sub = jax.random.split(key)
        w = xavier_uniform(sub, dims[i], dims[i + 1])      # [in, out]
        b = jnp.zeros((dims[i + 1],), dtype=jnp.float32)
        params.append((w, b))
    return params


def make_actor_forward(params, max_action, *, max_batch_tile=2048):
    """Builds a jitted forward fn: state [B, state_dim] -> action [B, action_dim]."""
    n_layers = len(params)
    state_dim = params[0][0].shape[0]
    action_dim = params[-1][0].shape[1]
    layer_dims = [(w.shape[0], w.shape[1]) for (w, _) in params]

    # Natural-width parameters: weights -> bf16 MXU operands, biases -> f32
    # rows of shape (1, out_dim) for in-kernel broadcast.  No padding needed:
    # each is passed as a single full-array block.
    flat_params = []
    for (w, b) in params:
        flat_params.append(w.astype(jnp.bfloat16))
        flat_params.append(b.reshape(1, -1).astype(jnp.float32))

    def actor_kernel(*refs):
        # refs = (x_ref, w0, b0, w1, b1, ..., wN-1, bN-1, o_ref)
        x_ref = refs[0]
        o_ref = refs[-1]
        h = x_ref[...]                                     # bf16 [tb, state_dim]
        for i in range(n_layers):
            w = refs[1 + 2 * i][...]                       # bf16 [in_dim, out_dim]
            b = refs[2 + 2 * i][...]                       # f32  [1, out_dim]
            acc = jnp.dot(h, w, preferred_element_type=jnp.float32) + b
            if i < n_layers - 1:
                # ReLU in f32 (v5e-safe), re-pack to bf16 as the next MXU operand.
                h = jnp.maximum(acc, 0.0).astype(jnp.bfloat16)
            else:
                h = jnp.tanh(acc)                          # f32, EUP
        o_ref[...] = (max_action * h).astype(o_ref.dtype)

    def forward(state):
        batch = state.shape[0]
        batch_r = _round_up(batch, TB_GRAIN)

        # Tile selection: minimize batch slack, amortize per-step overhead,
        # and (when the batch allows) use >= 2 tiles so both v7x TensorCores
        # get work.  All of this is static (trace-time) arithmetic.
        n_tiles = max(pl.cdiv(batch_r, max_batch_tile),
                      2 if batch_r >= 2 * TB_GRAIN else 1)
        tb = _round_up(pl.cdiv(batch_r, n_tiles), TB_GRAIN)
        n_tiles = pl.cdiv(batch_r, tb)
        padded_b = n_tiles * tb

        # bf16 state; only the batch dim is padded (to the tile boundary).
        x = state.astype(jnp.bfloat16)
        if padded_b != batch:
            x = jnp.pad(x, ((0, padded_b - batch), (0, 0)))

        # State tiles stream over the batch grid; weights/biases use a constant
        # index_map so they are copied to VMEM once and stay resident.
        in_specs = [pl.BlockSpec((tb, state_dim), lambda i: (i, 0))]
        for j in range(n_layers):
            w = flat_params[2 * j]
            b = flat_params[2 * j + 1]
            in_specs.append(pl.BlockSpec(w.shape, lambda i: (0, 0)))
            in_specs.append(pl.BlockSpec(b.shape, lambda i: (0, 0)))
        out_spec = pl.BlockSpec((tb, action_dim), lambda i: (i, 0))

        flops = 2 * padded_b * sum(di * do for di, do in layer_dims)
        bytes_accessed = (
            2 * padded_b * state_dim                 # bf16 input stream
            + 4 * padded_b * action_dim              # f32 output stream
            + sum(int(p.size) * p.dtype.itemsize for p in flat_params)
        )
        cost = pl.CostEstimate(
            flops=int(flops),
            transcendentals=int(padded_b * action_dim),
            bytes_accessed=int(bytes_accessed),
        )

        out = pl.pallas_call(
            actor_kernel,
            out_shape=jax.ShapeDtypeStruct((padded_b, action_dim), jnp.float32),
            grid=(n_tiles,),
            in_specs=in_specs,
            out_specs=out_spec,
            compiler_params=pltpu.CompilerParams(
                dimension_semantics=("parallel",),
                vmem_limit_bytes=32 * 1024 * 1024,
            ),
            cost_estimate=cost,
        )(x, *flat_params)
        # Only batch rows were padded; padded rows are row-independent junk
        # and are discarded here.
        return out[:batch]

    return jax.jit(forward)


def actor_reference(state, params, max_action):
    """Plain-JAX f32 reference (PyTorch semantics) for correctness checking."""
    h = state
    for i, (w, b) in enumerate(params):
        h = h @ w + b
        h = jnp.maximum(h, 0.0) if i < len(params) - 1 else jnp.tanh(h)
    return max_action * h


if __name__ == "__main__":
    # Small demo shapes (module defaults for the hidden widths).
    batch = 64
    state_dim = 16
    action_dim = 8
    hidden_dims = [256, 256]   # config default: hidden_dims=[256, 256]
    max_action = 2.0

    key = jax.random.PRNGKey(0)
    pkey, skey = jax.random.split(key)

    params = init_actor_params(pkey, state_dim, action_dim, hidden_dims)
    state = jax.random.normal(skey, (batch, state_dim), dtype=jnp.float32)

    # batch=64 -> two 32-row tiles (exercises the batch grid + resident
    # weights); production batches would get up to 2048-row tiles.
    forward = make_actor_forward(params, max_action)
    out = forward(state)
    jax.block_until_ready(out)

    ref = actor_reference(state, params, max_action)
    assert out.shape == (batch, action_dim)
    # bf16 MXU operands (weights + state) with f32 accumulation: compare
    # against the f32 reference with a correspondingly relaxed tolerance.
    assert jnp.allclose(out, ref, atol=5e-2, rtol=5e-2), \
        "Pallas kernel mismatch vs reference"

    print("KERNEL_OK")
</pallas_src>

<mosaic_0001>
module attributes {stable_mosaic.version = 11 : i64} {
  func.func @actor_kernel(%arg0: i32, %arg1: memref<32x16xbf16, #tpu.memory_space<vmem>>, %arg2: memref<16x256xbf16, #tpu.memory_space<vmem>>, %arg3: memref<1x256xf32, #tpu.memory_space<vmem>>, %arg4: memref<256x256xbf16, #tpu.memory_space<vmem>>, %arg5: memref<1x256xf32, #tpu.memory_space<vmem>>, %arg6: memref<256x8xbf16, #tpu.memory_space<vmem>>, %arg7: memref<1x8xf32, #tpu.memory_space<vmem>>, %arg8: memref<32x8xf32, #tpu.memory_space<vmem>>) attributes {dimension_semantics = [#tpu.dimension_semantics<parallel>], iteration_bounds = array<i64: 2>, scalar_prefetch = 0 : i64, scratch_operands = 0 : i64, tpu.core_type = #tpu.core_type<tc>, window_params = [{transform_indices = @transform_0, window_bounds = array<i64: 32, 16>}, {pipeline_mode = #tpu.pipeline_mode<synchronous>, transform_indices = @transform_1, window_bounds = array<i64: 16, 256>}, {pipeline_mode = #tpu.pipeline_mode<synchronous>, transform_indices = @transform_2, window_bounds = array<i64: 1, 256>}, {pipeline_mode = #tpu.pipeline_mode<synchronous>, transform_indices = @transform_3, window_bounds = array<i64: 256, 256>}, {pipeline_mode = #tpu.pipeline_mode<synchronous>, transform_indices = @transform_4, window_bounds = array<i64: 1, 256>}, {pipeline_mode = #tpu.pipeline_mode<synchronous>, transform_indices = @transform_5, window_bounds = array<i64: 256, 8>}, {pipeline_mode = #tpu.pipeline_mode<synchronous>, transform_indices = @transform_6, window_bounds = array<i64: 1, 8>}, {transform_indices = @transform_7, window_bounds = array<i64: 32, 8>}]} {
    %c0 = arith.constant 0 : index
    %c0_0 = arith.constant 0 : index
    %0 = vector.load %arg1[%c0, %c0_0] : memref<32x16xbf16, #tpu.memory_space<vmem>>, vector<32x16xbf16>
    %c0_1 = arith.constant 0 : index
    %c0_2 = arith.constant 0 : index
    %1 = vector.load %arg2[%c0_1, %c0_2] : memref<16x256xbf16, #tpu.memory_space<vmem>>, vector<16x256xbf16>
    %c0_3 = arith.constant 0 : index
    %c0_4 = arith.constant 0 : index
    %2 = vector.load %arg3[%c0_3, %c0_4] : memref<1x256xf32, #tpu.memory_space<vmem>>, vector<1x256xf32>
    %cst = arith.constant dense<0.000000e+00> : vector<32x256xf32>
    %3 = tpu.matmul %0, %1, %cst {dimension_numbers = #tpu.dot_dimension_numbers<[1], [0], [0], [1], [0, 0, 1, 1], [], []>} : vector<32x16xbf16>, vector<16x256xbf16>, vector<32x256xf32> -> vector<32x256xf32>
    %4 = vector.broadcast %2 : vector<1x256xf32> to vector<32x256xf32>
    %5 = arith.addf %3, %4 : vector<32x256xf32>
    %cst_5 = arith.constant 0.000000e+00 : f32
    %6 = vector.broadcast %cst_5 : f32 to vector<32x256xf32>
    %7 = arith.maximumf %5, %6 : vector<32x256xf32>
    %8 = arith.truncf %7 : vector<32x256xf32> to vector<32x256xbf16>
    %c0_6 = arith.constant 0 : index
    %c0_7 = arith.constant 0 : index
    %9 = vector.load %arg4[%c0_6, %c0_7] : memref<256x256xbf16, #tpu.memory_space<vmem>>, vector<256x256xbf16>
    %c0_8 = arith.constant 0 : index
    %c0_9 = arith.constant 0 : index
    %10 = vector.load %arg5[%c0_8, %c0_9] : memref<1x256xf32, #tpu.memory_space<vmem>>, vector<1x256xf32>
    %cst_10 = arith.constant dense<0.000000e+00> : vector<32x256xf32>
    %11 = tpu.matmul %8, %9, %cst_10 {dimension_numbers = #tpu.dot_dimension_numbers<[1], [0], [0], [1], [0, 0, 1, 1], [], []>} : vector<32x256xbf16>, vector<256x256xbf16>, vector<32x256xf32> -> vector<32x256xf32>
    %12 = vector.broadcast %10 : vector<1x256xf32> to vector<32x256xf32>
    %13 = arith.addf %11, %12 : vector<32x256xf32>
    %cst_11 = arith.constant 0.000000e+00 : f32
    %14 = vector.broadcast %cst_11 : f32 to vector<32x256xf32>
    %15 = arith.maximumf %13, %14 : vector<32x256xf32>
    %16 = arith.truncf %15 : vector<32x256xf32> to vector<32x256xbf16>
    %c0_12 = arith.constant 0 : index
    %c0_13 = arith.constant 0 : index
    %17 = vector.load %arg6[%c0_12, %c0_13] : memref<256x8xbf16, #tpu.memory_space<vmem>>, vector<256x8xbf16>
    %c0_14 = arith.constant 0 : index
    %c0_15 = arith.constant 0 : index
    %18 = vector.load %arg7[%c0_14, %c0_15] : memref<1x8xf32, #tpu.memory_space<vmem>>, vector<1x8xf32>
    %cst_16 = arith.constant dense<0.000000e+00> : vector<32x8xf32>
    %19 = tpu.matmul %16, %17, %cst_16 {dimension_numbers = #tpu.dot_dimension_numbers<[1], [0], [0], [1], [0, 0, 1, 1], [], []>} : vector<32x256xbf16>, vector<256x8xbf16>, vector<32x8xf32> -> vector<32x8xf32>
    %20 = vector.broadcast %18 : vector<1x8xf32> to vector<32x8xf32>
    %21 = arith.addf %19, %20 : vector<32x8xf32>
    %22 = math.tanh %21 : vector<32x8xf32>
    %cst_17 = arith.constant 2.000000e+00 : f32
    %23 = vector.broadcast %cst_17 : f32 to vector<32x8xf32>
    %24 = arith.mulf %23, %22 : vector<32x8xf32>
    %c0_18 = arith.constant 0 : index
    %c0_19 = arith.constant 0 : index
    %25 = vector.load %arg8[%c0_18, %c0_19] : memref<32x8xf32, #tpu.memory_space<vmem>>, vector<32x8xf32>
    tpu.vector_store %arg8[%c0_18, %c0_19], %24 {strides = array<i32>} : memref<32x8xf32, #tpu.memory_space<vmem>>, vector<32x8xf32>,
    return
  }
  func.func @transform_0(%arg0: i32) -> (i32, i32) {
    %c0_i32 = arith.constant 0 : i32
    %c0_i32_0 = arith.constant 0 : i32
    return %arg0, %c0_i32 : i32, i32
  }
  func.func @transform_1(%arg0: i32) -> (i32, i32) {
    %c0_i32 = arith.constant 0 : i32
    %c0_i32_0 = arith.constant 0 : i32
    %c0_i32_1 = arith.constant 0 : i32
    return %c0_i32, %c0_i32_0 : i32, i32
  }
  func.func @transform_2(%arg0: i32) -> (i32, i32) {
    %c0_i32 = arith.constant 0 : i32
    %c0_i32_0 = arith.constant 0 : i32
    %c0_i32_1 = arith.constant 0 : i32
    return %c0_i32, %c0_i32_0 : i32, i32
  }
  func.func @transform_3(%arg0: i32) -> (i32, i32) {
    %c0_i32 = arith.constant 0 : i32
    %c0_i32_0 = arith.constant 0 : i32
    %c0_i32_1 = arith.constant 0 : i32
    return %c0_i32, %c0_i32_0 : i32, i32
  }
  func.func @transform_4(%arg0: i32) -> (i32, i32) {
    %c0_i32 = arith.constant 0 : i32
    %c0_i32_0 = arith.constant 0 : i32
    %c0_i32_1 = arith.constant 0 : i32
    return %c0_i32, %c0_i32_0 : i32, i32
  }
  func.func @transform_5(%arg0: i32) -> (i32, i32) {
    %c0_i32 = arith.constant 0 : i32
    %c0_i32_0 = arith.constant 0 : i32
    %c0_i32_1 = arith.constant 0 : i32
    return %c0_i32, %c0_i32_0 : i32, i32
  }
  func.func @transform_6(%arg0: i32) -> (i32, i32) {
    %c0_i32 = arith.constant 0 : i32
    %c0_i32_0 = arith.constant 0 : i32
    %c0_i32_1 = arith.constant 0 : i32
    return %c0_i32, %c0_i32_0 : i32, i32
  }
  func.func @transform_7(%arg0: i32) -> (i32, i32) {
    %c0_i32 = arith.constant 0 : i32
    %c0_i32_0 = arith.constant 0 : i32
    return %arg0, %c0_i32 : i32, i32
  }
}

</mosaic_0001>

<bundles_post_ra>
// kernel: forward.1
= control target key start
LH: loop header
LB: loop body
LE: loop exit
PB: predicated region body
PF: predicated region fallthrough
CT: control target
= control target key end

     0   :  { %12 = vsyncpa [#allocation3], 0  ;;  %s1377_s0 = inlined_call_operand.vmem [shape: bf16[64,16], index: 0, kind: input, shape index: {}]   ;;  %s1378_s1 = inlined_call_operand.vmem [shape: bf16[16,256], index: 1, kind: input, shape index: {}]   ;;  %s1379_s2 = inlined_call_operand.vmem [shape: f32[1,256], index: 2, kind: input, shape index: {}, may-alias: {2,4}]   ;;  %s1380_s3 = inlined_call_operand.hbm [shape: bf16[256,256], index: 3, kind: input, shape index: {}]   ;;  %s1381_s4 = inlined_call_operand.vmem [shape: f32[1,256], index: 4, kind: input, shape index: {}, may-alias: {2,4}]   ;;  %s1382_s5 = inlined_call_operand.hbm [shape: bf16[256,8], index: 5, kind: input, shape index: {}]   ;;  %s1383_s6 = inlined_call_operand.vmem [shape: f32[1,8], index: 6, kind: input, shape index: {}]   ;;  %s1384_s7 = inlined_call_operand.vmem [shape: f32[64,8], index: 7, kind: output, shape index: {}]  }
   0x1   :  { %13 = vsyncpa [#allocation5], 0  ;;  %s1291_s24 = smov 0  }
   0x2 LB: > { %s1244_s25 = smov [#allocation2]   ;;  %s967_s27 = sadd.s32 4294967295, %s1242_s24   ;;  %s1242_s24 = sphi %s1291_s24, %s19_s24  }
   0x3   : > { %s220_s26 = sshll.u32 %s1244_s25, 4  ;;  %p969_p0 = scmp.ge.s32.totalorder %s1242_s24, 1  ;;  %s221_s26 = int_to_ptr.vmem [resolvable:$true] %s220_s26 }
   0x4   : > { %p202_p1 = scmp.lt.s32.totalorder %s1242_s24, 3  ;;  %p1305_p3 = scmp.eq.s32.totalorder %s967_s27, 0 }
   0x5   : > { %s1245_s30 = smov [#allocation4]   ;;  %s1187_s10 = scalar_lea.vmem %s221_s26, 4096 }
   0x6   : > { %p1299_p2 = pnand %p969_p0, %p202_p1  ;;  %s236_s8 = sshll.u32 %s1245_s30, 4  ;;  %s237_s8 = int_to_ptr.vmem [resolvable:$true] %s236_s8 }
   0x7   : > { %p1188_p7 = scmp.ne.s32.totalorder %s221_s26, %s1187_s10  ;;  %p1195_p10 = scmp.lt.s32.totalorder %s221_s26, %s221_s26 }
   0x8   : > { %p1073_p4 = pneg %p1299_p2  ;;  %p1196_p11 = scmp.lt.s32.totalorder %s1187_s10, %s1187_s10 }
   0xa   : > { %p1313_p5 = pnand %p1305_p3, %p1073_p4  ;;  %p1197_p12 = por %p1196_p11, %p1195_p10 }
   0xc   : > { %p1178_p6 = pneg %p1313_p5 }
   0xe   : > { %p1190_p8 = pnand %p1188_p7, %p1178_p6 }
  0x10   : > { %p1191_p9 = pneg %p1190_p8 }
  0x12   : > { %p1198_p13 = pnand %p1197_p12, %p1191_p9 }
  0x14   : > { %1201 = shalt.err (!%p1198_p13)
}
  0x15   : > { %s1246_s11 = smov 128   ;;  %s1247_s12 = smov 8  }
  0x16   : > { %1076 = dma.hbm_to_vmem [thread:$0]  (!%p1313_p5), %s1380_s3, 4096, %s221_s26, [#allocation3], %s1246_s11, %s1246_s11, %s1247_s12  }
  0x17   : > { %s1213_s15 = scalar_lea.vmem %s237_s8, 2048  ;;  %p1221_p7 = scmp.lt.s32.totalorder %s237_s8, %s237_s8 }
  0x18   : > { %p1214_p0 = scmp.ne.s32.totalorder %s237_s8, %s1213_s15  ;;  %p1222_p8 = scmp.lt.s32.totalorder %s1213_s15, %s1213_s15 }
  0x1a   : > { %p1216_p1 = pnand %p1214_p0, %p1178_p6  ;;  %p1223_p10 = por %p1222_p8, %p1221_p7 }
  0x1c   : > { %p1217_p4 = pneg %p1216_p1 }
  0x1e   : > { %p1224_p9 = pnand %p1223_p10, %p1217_p4 }
  0x20   : > { %1227 = shalt.err (!%p1224_p9)
}
  0x21   : > { %s1248_s16 = smov 64   ;;  %s1249_s17 = smov 4  }
  0x22   : > { %1079 = dma.hbm_to_vmem [thread:$0]  (!%p1313_p5), %s1382_s5, 2048, %s237_s8, [#allocation5], %s1248_s16, %s1248_s16, %s1249_s17  }
  0x23   : > { %264 = sbr.rel (%p1299_p2) target bundleno = 690 (0x2b2), region = 48 }
  0x28   : > { %1233 = dma.done.wait (%p1305_p3), [#allocation3], 4096  }
  0x29   : > { %1235 = vsyncadd (%p1305_p3), [#allocation3], 4294963200 }
  0x2a   : > { %1237 = dma.done.wait (%p1305_p3), [#allocation5], 2048  }
  0x2b   : > { %1239 = vsyncadd (%p1305_p3), [#allocation5], 4294965248  ;;  %s976_s20 = sshll.u32 %s967_s27, 2  ;;  %v1250_v0 = vmov 0   ;;  %v1099_v1 = vld [vmem:[%s1378_s1 + $0x4] ss:$8 sps:$4 sm:$0xff]   ;;  %v321_v47 = vlaneseq }
  0x2c   : > { %390 = vmatprep.mubr.bf16.mxu0 %v1250_v0  ;;  %p301_p5 = scmp.lt.s32.totalorder %s976_s20, 7  ;;  %v1101_v2 = vld [vmem:[%s1378_s1] ss:$8 sps:$4 sm:$0xff]   ;;  %372 = vmatprep.subr.bf16.mxu0 %v1099_v1  ;;  %vm351_vm0 = vcmask 130048   ;;  %v1104_v4 = vld [vmem:[#allocation2 + $0x74] ss:$8 sps:$4 sm:$0xff]  }
  0x2d   : > { %373 = vmatpush1.bf16.msra.mxu0 %v1101_v2  ;;  %v1106_v5 = vld [vmem:[#allocation2 + $0x70] ss:$8 sps:$4 sm:$0xff]   ;;  %v1107_v6 = vld [vmem:[#allocation2 + $0x64] ss:$8 sps:$4 sm:$0xff]   ;;  %627 = vmatprep.subr.bf16.mxu1 %v1104_v4  ;;  %v1109_v7 = vld [vmem:[#allocation2 + $0x60] ss:$8 sps:$4 sm:$0xff]  }
  0x2e   : > { %s1389_s20 = smov (!%p301_p5, %s976_s20), 7  ;;  %628 = vmatpush1.bf16.msra.mxu1 %v1106_v5  ;;  %v1110_v8 = vld [vmem:[#allocation2 + $0x54] ss:$8 sps:$4 sm:$0xff]   ;;  %v1112_v10 = vld [vmem:[#allocation2 + $0x50] ss:$8 sps:$4 sm:$0xff]   ;;  %v1156_v41 = vld [vmem:[#allocation4 + $0x68] sm:$0xff]  }
  0x2f   : > { %s977_s21 = sshll.u32 %s1389_s20, 2  ;;  %629 = vmatprep.subr.bf16.mxu1 %v1107_v6  ;;  %v1113_v11 = vld [vmem:[#allocation2 + $0x44] ss:$8 sps:$4 sm:$0xff]   ;;  %v1115_v12 = vld [vmem:[#allocation2 + $0x40] ss:$8 sps:$4 sm:$0xff]   ;;  %v1152_v37 = vld [vmem:[#allocation4 + $0x78] sm:$0xff]  }
  0x30   : > { %s304_s25 = scalar_lea.vmem %s1377_s0, %s977_s21  ;;  %v1116_v13 = vld [vmem:[#allocation2 + $0x34] ss:$8 sps:$4 sm:$0xff]   ;;  %v1118_v14 = vld [vmem:[#allocation2 + $0x30] ss:$8 sps:$4 sm:$0xff]   ;;  %v1119_v15 = vld [vmem:[#allocation2 + $0x24] ss:$8 sps:$4 sm:$0xff]   ;;  %1037 = vmatprep.subr.bf16.mxu0 %v1152_v37 }
  0x31   : > { %v1102_v3 = vld [vmem:[%s304_s25] sm:$0xff]   ;;  %v1103_v9 = vld [vmem:[%s304_s25 + $0x8] sm:$0xff]   ;;  %v1122_v17 = vld [vmem:[#allocation2 + $0x14] ss:$8 sps:$4 sm:$0xff]   ;;  %v322_v48 = vshrl.u32 %v321_v47, 7  ;;  %s979_s13 = sshll.u32 %s1389_s20, 3 }
  0x32   : > { %984 = vmatmul.mubr.msk.bf16.vlgmr.msra.gmra.mxu0 %vm351_vm0, %v1102_v3  ;;  %630 = vmatpush1.bf16.msra.mxu1 %v1109_v7  ;;  %v1121_v16 = vld [vmem:[#allocation2 + $0x20] ss:$8 sps:$4 sm:$0xff]   ;;  %v1124_v18 = vld [vmem:[#allocation2 + $0x10] ss:$8 sps:$4 sm:$0xff]   ;;  %v1125_v19 = vld [vmem:[#allocation2 + $0x4] ss:$8 sps:$4 sm:$0xff]   ;;  %s310_s16 = scalar_lea.vmem %s1384_s7, %s979_s13 }
  0x33   : > { %400 = vmatprep.mubr.bf16.mxu0 %v1250_v0  ;;  %631 = vmatprep.subr.bf16.mxu1 %v1110_v8  ;;  %v1127_v20 = vld [vmem:[#allocation2] ss:$8 sps:$4 sm:$0xff]   ;;  %v1128_v21 = vld [vmem:[#allocation2 + $0xf4] ss:$8 sps:$4 sm:$0xff]   ;;  %v1130_v22 = vld [vmem:[#allocation2 + $0xf0] ss:$8 sps:$4 sm:$0xff]  }
  0x34   : > { %v1131_v23 = vld [vmem:[#allocation2 + $0xe4] ss:$8 sps:$4 sm:$0xff]   ;;  %v1133_v24 = vld [vmem:[#allocation2 + $0xe0] ss:$8 sps:$4 sm:$0xff]   ;;  %v1134_v25 = vld [vmem:[#allocation2 + $0xd4] ss:$8 sps:$4 sm:$0xff]  }
  0x35   : > { %v1136_v26 = vld [vmem:[#allocation2 + $0xd0] ss:$8 sps:$4 sm:$0xff]   ;;  %v1137_v27 = vld [vmem:[#allocation2 + $0xc4] ss:$8 sps:$4 sm:$0xff]   ;;  %v1139_v28 = vld [vmem:[#allocation2 + $0xc0] ss:$8 sps:$4 sm:$0xff]  }
  0x36   : > { %632 = vmatpush1.bf16.msra.mxu1 %v1112_v10  ;;  %v1140_v29 = vld [vmem:[#allocation2 + $0xb4] ss:$8 sps:$4 sm:$0xff]   ;;  %v1142_v30 = vld [vmem:[#allocation2 + $0xb0] ss:$8 sps:$4 sm:$0xff]   ;;  %v1143_v31 = vld [vmem:[#allocation2 + $0xa4] ss:$8 sps:$4 sm:$0xff]  }
  0x37   : > { %633 = vmatprep.subr.bf16.mxu1 %v1113_v11  ;;  %v1145_v32 = vld [vmem:[#allocation2 + $0xa0] ss:$8 sps:$4 sm:$0xff]   ;;  %v1146_v33 = vld [vmem:[#allocation2 + $0x94] ss:$8 sps:$4 sm:$0xff]   ;;  %v1148_v34 = vld [vmem:[#allocation2 + $0x90] ss:$8 sps:$4 sm:$0xff]  }
  0x38   : > { %v1149_v35 = vld [vmem:[#allocation2 + $0x84] ss:$8 sps:$4 sm:$0xff]   ;;  %v1151_v36 = vld [vmem:[#allocation2 + $0x80] ss:$8 sps:$4 sm:$0xff]   ;;  %v1153_v38 = vld [vmem:[#allocation4 + $0x38] sm:$0xff]   ;;  %v327_v49 = vsub.s32 1, %v322_v48 }
  0x39   : > { %v1154_v39 = vld [vmem:[#allocation4 + $0x70] sm:$0xff]   ;;  %1038 = vmatpush3.bf16.msra.mxu0 %v1153_v38  ;;  %v1157_v42 = vld [vmem:[#allocation4 + $0x28] sm:$0xff]   ;;  %v1158_v43 = vld [vmem:[#allocation4 + $0x60] sm:$0xff]   ;;  %v323_v50 = vsub.s32 0, %v322_v48  ;;  %vm884_vm1 = vcmask 64512  }
  0x3a   : > { %985 = vmatmul.mubr.msk.bf16.gmra.mxu0 %vm351_vm0, %v1103_v9  ;;  %634 = vmatpush1.bf16.msra.mxu1 %v1115_v12  ;;  %v1155_v40 = vld [vmem:[#allocation4 + $0x30] sm:$0xff]   ;;  %v1159_v44 = vld [vmem:[#allocation4 + $0x20] sm:$0xff]   ;;  %v1160_v45 = vld [vmem:[#allocation4 + $0x58] sm:$0xff]  }
  0x3b   : > { %635 = vmatprep.subr.bf16.mxu1 %v1116_v13  ;;  %1039 = vmatprep.subr.bf16.mxu0 %v1154_v39  ;;  %v1161_v46 = vld [vmem:[#allocation4 + $0x18] sm:$0xff]   ;;  %v319_v51 = vld [vmem:[%s1379_s2] sm:$0x3] }
  0x3c   : > { %v328_v53 = vrot.slane %v319_v51, %v327_v49  ;;  %v324_v54 = vrot.slane %v319_v51, %v323_v50 }
  0x3d   : > { %1040 = vmatpush3.bf16.msra.mxu0 %v1155_v40 }
  0x3e   : > { %636 = vmatpush1.bf16.msra.mxu1 %v1118_v14  ;;  %1041 = vmatprep.subr.bf16.mxu0 %v1156_v41 }
  0x3f   : > { %637 = vmatprep.subr.bf16.mxu1 %v1119_v15 }
  0x41   : > { %1042 = vmatpush3.bf16.msra.mxu0 %v1157_v42 }
  0x42   : > { %638 = vmatpush1.bf16.msra.mxu1 %v1121_v16  ;;  %1043 = vmatprep.subr.bf16.mxu0 %v1158_v43 }
  0x43   : > { %639 = vmatprep.subr.bf16.mxu1 %v1122_v17 }
  0x45   : > { %1044 = vmatpush3.bf16.msra.mxu0 %v1159_v44 }
  0x46   : > { %640 = vmatpush1.bf16.msra.mxu1 %v1124_v18  ;;  %1045 = vmatprep.subr.bf16.mxu0 %v1160_v45  ;;  %v1162_v18 = vld [vmem:[#allocation4 + $0x50] sm:$0xff]  }
  0x47   : > { %641 = vmatprep.subr.bf16.mxu1 %v1125_v19  ;;  %v1163_v19 = vld [vmem:[#allocation4 + $0x10] sm:$0xff]  }
  0x49   : > { %1046 = vmatpush3.bf16.msra.mxu0 %v1161_v46 }
  0x4a   : > { %642 = vmatpush1.bf16.msra.mxu1 %v1127_v20  ;;  %1047 = vmatprep.subr.bf16.mxu0 %v1162_v18  ;;  %v1164_v20 = vld [vmem:[#allocation4 + $0x48] sm:$0xff]  }
  0x4b   : > { %643 = vmatprep.subr.bf16.mxu1 %v1128_v21  ;;  %v1165_v21 = vld [vmem:[#allocation4 + $0x8] sm:$0xff]  }
  0x4d   : > { %1048 = vmatpush3.bf16.msra.mxu0 %v1163_v19 }
  0x4e   : > { %644 = vmatpush2.bf16.msra.mxu1 %v1130_v22  ;;  %1049 = vmatprep.subr.bf16.mxu0 %v1164_v20  ;;  %v1166_v22 = vld [vmem:[#allocation4 + $0x40] sm:$0xff]  }
  0x4f   : > { %645 = vmatprep.subr.bf16.mxu1 %v1131_v23  ;;  %v1167_v23 = vld [vmem:[#allocation4] sm:$0xff]  }
  0x51   : > { %1050 = vmatpush3.bf16.msra.mxu0 %v1165_v21 }
  0x52   : > { %646 = vmatpush2.bf16.msra.mxu1 %v1133_v24  ;;  %1051 = vmatprep.subr.bf16.mxu0 %v1166_v22  ;;  %v455_v24 = vld [vmem:[%s1381_s4] sm:$0x3] }
  0x53   : > { %647 = vmatprep.subr.bf16.mxu1 %v1134_v25 }
  0x55   : > { %1052 = vmatpush3.bf16.msra.mxu0 %v1167_v23 }
  0x56   : > { %648 = vmatpush2.bf16.msra.mxu1 %v1136_v26  ;;  %v464_v26 = vrot.slane %v455_v24, %v327_v49 }
  0x57   : > { %649 = vmatprep.subr.bf16.mxu1 %v1137_v27  ;;  %v460_v27 = vrot.slane %v455_v24, %v323_v50 }
  0x5a   : > { %650 = vmatpush2.bf16.msra.mxu1 %v1139_v28 }
  0x5b   : > { %651 = vmatprep.subr.bf16.mxu1 %v1140_v29 }
  0x5e   : > { %652 = vmatpush2.bf16.msra.mxu1 %v1142_v30 }
  0x5f   : > { %653 = vmatprep.subr.bf16.mxu1 %v1143_v31 }
  0x62   : > { %654 = vmatpush2.bf16.msra.mxu1 %v1145_v32 }
  0x63   : > { %655 = vmatprep.subr.bf16.mxu1 %v1146_v33 }
  0x66   : > { %656 = vmatpush2.bf16.msra.mxu1 %v1148_v34 }
  0x67   : > { %657 = vmatprep.subr.bf16.mxu1 %v1149_v35 }
  0x6a   : > { %658 = vmatpush2.bf16.msra.mxu1 %v1151_v36 }
  0xf2   : > { %v392_v52 = vpop.f32.mrf.mxu0 }
  0xf3   : > { %v393_v59 = vadd.f32 %v392_v52, %v324_v54 }
  0xf4   : > { %v394_v55 = vpop.f32.mrf.mxu0 }
  0xf5   : > { %v395_v57 = vadd.f32 %v394_v55, %v328_v53  ;;  %v411_v2 = vmax.f32 %v393_v59, 0.0 }
  0xf6   : > { %v396_v56 = vpop.f32.mrf.mxu0 }
  0xf7   : > { %v397_v58 = vadd.f32 %v396_v56, %v324_v54  ;;  %v412_v0 = vmax.f32 %v395_v57, 0.0  ;;  %v1018_v56 = vld [vmem:[%s1383_s6] ss:$0 sm:$0xff] }
  0xf8   : > { %v398_v60 = vpop.f32.mrf.mxu0 }
  0xf9   : > { %v399_v61 = vadd.f32 %v398_v60, %v328_v53  ;;  %v413_v62 = vmax.f32 %v397_v58, 0.0 }
  0xfa   : > { %v402_v63 = vpop.f32.mrf.mxu0 }
  0xfb   : > { %v414_v1 = vmax.f32 %v399_v61, 0.0  ;;  %v419_v5 = vpack.c.bf16 %v413_v62, %v411_v2  ;;  %v403_v9 = vadd.f32 %v402_v63, %v324_v54 }
  0xfc   : > { %v404_v3 = vpop.f32.mrf.mxu0 }
  0xfd   : > { %v420_v4 = vpack.c.bf16 %v414_v1, %v412_v0  ;;  %v405_v7 = vadd.f32 %v404_v3, %v328_v53  ;;  %v415_v15 = vmax.f32 %v403_v9, 0.0 }
  0xfe   : > { %v406_v6 = vpop.f32.mrf.mxu0 }
  0xff   : > { %v407_v8 = vadd.f32 %v406_v6, %v324_v54  ;;  %659 = vmatprep.mubr.bf16.mxu1 %v420_v4  ;;  %v416_v13 = vmax.f32 %v405_v7, 0.0 }
 0x100   : > { %v408_v10 = vpop.f32.mrf.mxu0  ;;  %660 = vmatmul.mubr.bf16.vlgmr.msra.gmra.mxu1 %v419_v5 }
 0x101   : > { %v409_v11 = vadd.f32 %v408_v10, %v328_v53  ;;  %v417_v12 = vmax.f32 %v407_v8, 0.0 }
 0x103   : > { %v418_v14 = vmax.f32 %v409_v11, 0.0  ;;  %v421_v17 = vpack.c.bf16 %v417_v12, %v415_v15 }
 0x105   : > { %v422_v16 = vpack.c.bf16 %v418_v14, %v416_v13 }
 0x107   : > { %669 = vmatprep.mubr.bf16.mxu1 %v422_v16 }
 0x108   : > { %670 = vmatmul.mubr.bf16.gmra.mxu1 %v421_v17 }
 0x1c0   : > { %v661_v25 = vpop.f32.mrf.mxu1 }
 0x1c1   : > { %v662_v32 = vadd.f32 %v661_v25, %v460_v27 }
 0x1c2   : > { %v663_v28 = vpop.f32.mrf.mxu1 }
 0x1c3   : > { %v664_v30 = vadd.f32 %v663_v28, %v464_v26  ;;  %v680_v39 = vmax.f32 %v662_v32, 0.0 }
 0x1c4   : > { %v665_v29 = vpop.f32.mrf.mxu1 }
 0x1c5   : > { %v666_v31 = vadd.f32 %v665_v29, %v460_v27  ;;  %v681_v37 = vmax.f32 %v664_v30, 0.0 }
 0x1c6   : > { %v667_v33 = vpop.f32.mrf.mxu1 }
 0x1c7   : > { %v668_v34 = vadd.f32 %v667_v33, %v464_v26  ;;  %v682_v35 = vmax.f32 %v666_v31, 0.0 }
 0x1c8   : > { %v671_v36 = vpop.f32.mrf.mxu1 }
 0x1c9   : > { %v683_v38 = vmax.f32 %v668_v34, 0.0  ;;  %v688_v42 = vpack.c.bf16 %v682_v35, %v680_v39  ;;  %v672_v46 = vadd.f32 %v671_v36, %v460_v27 }
 0x1ca   : > { %v673_v40 = vpop.f32.mrf.mxu1 }
 0x1cb   : > { %v689_v41 = vpack.c.bf16 %v683_v38, %v681_v37  ;;  %v674_v44 = vadd.f32 %v673_v40, %v464_v26  ;;  %v684_v52 = vmax.f32 %v672_v46, 0.0 }
 0x1cc   : > { %v675_v43 = vpop.f32.mrf.mxu1 }
 0x1cd   : > { %v676_v45 = vadd.f32 %v675_v43, %v460_v27  ;;  %859 = vmatprep.mubr.bf16.mxu0 %v689_v41  ;;  %v685_v50 = vmax.f32 %v674_v44, 0.0 }
 0x1ce   : > { %v677_v47 = vpop.f32.mrf.mxu1  ;;  %860 = vmatmul.mubr.bf16.vlgmr.msra.gmra.mxu0 %v688_v42 }
 0x1cf   : > { %v678_v48 = vadd.f32 %v677_v47, %v464_v26  ;;  %v686_v49 = vmax.f32 %v676_v45, 0.0 }
 0x1d1   : > { %v687_v51 = vmax.f32 %v678_v48, 0.0  ;;  %v690_v54 = vpack.c.bf16 %v686_v49, %v684_v52 }
 0x1d3   : > { %v691_v53 = vpack.c.bf16 %v687_v51, %v685_v50 }
 0x1d5   : > { %867 = vmatprep.mubr.bf16.mxu0 %v691_v53 }
 0x1d6   : > { %868 = vmatmul.mubr.bf16.gmra.mxu0 %v690_v54 }
 0x28e   : > { %v1053_v55 = vpop.f32.mrf.mxu0 }
 0x290   : > { %v1054_v57 = vpop.f32.mrf.mxu0 }
 0x291   : > { %v1055_v58 = vadd.f32 %v1054_v57, %v1053_v55 }
 0x292   : > { %v1056_v59 = vpop.f32.mrf.mxu0 }
 0x293   : > { %v862_v60 = vadd.f32 %v1055_v58, %v1018_v56 }
 0x294   : > { %v1057_v61 = vpop.f32.mrf.mxu0 }
 0x295   : > { %1168 = vtanh.f32 %v862_v60  ;;  %v1058_v62 = vadd.f32 %v1057_v61, %v1056_v59 }
 0x296   : > { %v1059_v63 = vpop.f32.mrf.mxu0 }
 0x297   : > { %v865_v0 = vadd.f32 %v1058_v62, %v1018_v56 }
 0x298   : > { %v1060_v1 = vpop.f32.mrf.mxu0 }
 0x299   : > { %1170 = vtanh.f32 %v865_v0  ;;  %v1061_v2 = vadd.f32 %v1060_v1, %v1059_v63 }
 0x29a   : > { %v1062_v3 = vpop.f32.mrf.mxu0 }
 0x29b   : > { %v870_v4 = vadd.f32 %v1061_v2, %v1018_v56 }
 0x29c   : > { %v1063_v5 = vpop.f32.mrf.mxu0 }
 0x29d   : > { %1172 = vtanh.f32 %v870_v4  ;;  %v1064_v6 = vadd.f32 %v1063_v5, %v1062_v3 }
 0x29f   : > { %v873_v7 = vadd.f32 %v1064_v6, %v1018_v56 }
 0x2a1   : > { %1174 = vtanh.f32 %v873_v7 }
 0x2a2   : > { %v1169_v8 = vpop.eup %1168 }
 0x2a3   : > { %v880_v9 = vmul.f32 2.0, %v1169_v8 }
 0x2a5   : > { %885 = vst.msk [vmem:[%s310_s16] sm:$0xff] %vm884_vm1, %v880_v9 }
 0x2a6   : > { %v1171_v10 = vpop.eup %1170 }
 0x2a7   : > { %v881_v11 = vmul.f32 2.0, %v1171_v10 }
 0x2a9   : > { %886 = vst.msk [vmem:[%s310_s16 + $0x8] sm:$0xff] %vm884_vm1, %v881_v11 }
 0x2aa   : > { %v1173_v12 = vpop.eup %1172 }
 0x2ab   : > { %v882_v13 = vmul.f32 2.0, %v1173_v12 }
 0x2ad   : > { %887 = vst.msk [vmem:[%s310_s16 + $0x10] sm:$0xff] %vm884_vm1, %v882_v13 }
 0x2ae   : > { %v1175_v14 = vpop.eup %1174 }
 0x2af   : > { %v883_v15 = vmul.f32 2.0, %v1175_v14 }
 0x2b1   : > { %888 = vst.msk [vmem:[%s310_s16 + $0x18] sm:$0xff] %vm884_vm1, %v883_v15 }
 0x2b2 PF: > { %s19_s24 = sadd.s32 1, %s1242_s24  }
 0x2b3   : > { %p16_p2 = scmp.ge.s32.totalorder %s19_s24, 4  }
 0x2b5   :  { %18 = sbr.rel (!%p16_p2) target bundleno = 2 (0x2), region = 87 }
 0x2ba   :  { %911 = vsyncpa [#allocation3], 1 }
 0x2bb   :  { %913 = vsyncpa [#allocation3 + $0x1], 1 }
 0x2bc   :  { %914 = vsyncpa [#allocation5], 1 }

</bundles_post_ra>
